<compile_context>
chip_gen: v7x
topology: tpu7x:2x2x1
jax: 0.10.0
libtpu: 0.0.40
codegen_flags: <defaults>
</compile_context>

<pallas_src>
import jax
import jax.numpy as jnp
from jax.experimental import pallas as pl
from jax.experimental.pallas import tpu as pltpu

PART = 6              # PCB parts
FEAT = 2048           # ResNet50 layer4 channels
LIN = 256             # ClassBlock bottleneck ("linear=256")
NUM_CLASSES = 100     # demo class_num (deliberately NOT a multiple of 128)
BN_EPS = 1e-5
LANE = 128
SUB = 16              # bf16 sublane packing
FEAT_EXTRA = 8        # bias row + zero rows for contraction-dim alignment
FEAT_P = FEAT + FEAT_EXTRA


def pcb_head_kernel(x_ref, w_ref, o_ref):
    # x_ref: (B_pad, FEAT_P)   bf16 pooled part features (+ ones bias column)
    # w_ref: (FEAT_P, ntile)   bf16 folded head weight tile (+ bias row)
    # o_ref: (B_pad, ntile)    f32  logits tile
    o_ref[...] = jnp.dot(x_ref[...], w_ref[...],
                         preferred_element_type=jnp.float32)


def pcb_forward(x_nchw, folded_params):
    """x_nchw: [B, 2048, H, W] layer4 feature map (PyTorch NCHW layout).
    Returns y_local: list of 6 arrays [B, class_num] (global_circle=False)."""
    w_aug, ncls = folded_params
    B, C, H, W = x_nchw.shape
    assert C == FEAT

    # AdaptiveAvgPool2d((PART, 1)) with exact PyTorch bin boundaries
    # (start = floor(i*H/PART), end = ceil((i+1)*H/PART)); handles H % 6 != 0.
    parts = []
    for i in range(PART):
        h0 = (i * H) // PART
        h1 = -((-(i + 1) * H) // PART)
        parts.append(x_nchw[:, :, h0:h1, :].mean(axis=(2, 3)))
    pooled = jnp.stack(parts, axis=0)                # (PART, B, FEAT) f32
    # nn.Dropout layers (p=0.5): inference mode -> identity.

    featp = w_aug.shape[1]
    npad = w_aug.shape[-1]
    b_pad = ((B + SUB - 1) // SUB) * SUB

    # Augmented LHS: real features, a ones column (bias row of w_aug), zero
    # alignment columns, and zero sublane-padding rows (sliced off later).
    x_aug = jnp.zeros((PART, b_pad, featp), jnp.float32)
    x_aug = x_aug.at[:, :B, :FEAT].set(pooled)
    x_aug = x_aug.at[:, :B, FEAT].set(1.0)
    x_aug = x_aug.astype(jnp.bfloat16)

    # 256-wide N tiles for the 256-wide v6e/v7x MXUs when possible, else 128
    # (ideal for v5e's 128-wide MXUs).
    ntile = 256 if npad % 256 == 0 else 128
    n_tiles = npad // ntile

    out = pl.pallas_call(
        pcb_head_kernel,
        out_shape=jax.ShapeDtypeStruct((PART, b_pad, npad), jnp.float32),
        grid_spec=pltpu.PrefetchScalarGridSpec(
            num_scalar_prefetch=0,
            grid=(PART, n_tiles),
            in_specs=[
                # pooled block index is constant across the n axis -> no re-DMA
                pl.BlockSpec((None, b_pad, featp), lambda p, n: (p, 0, 0)),
                pl.BlockSpec((None, featp, ntile), lambda p, n: (p, 0, n)),
            ],
            out_specs=pl.BlockSpec((None, b_pad, ntile), lambda p, n: (p, 0, n)),
        ),
        compiler_params=pltpu.CompilerParams(
            dimension_semantics=("parallel", "arbitrary")),
    )(x_aug, w_aug)

    out = out[:, :B, :ncls]                  # drop sublane + lane padding
    return [out[i] for i in range(PART)]


def init_raw_params(key, class_num=NUM_CLASSES):
    """Synthetic parameters matching the PyTorch init scheme (eval mode)."""
    k1, k2, k3 = jax.random.split(key, 3)
    # add_block Linear(2048, 256): kaiming_normal(fan_out) -> std=sqrt(2/256);
    # stored pre-transposed as (in, out) so the head does x @ W1 directly.
    w1 = jax.random.normal(k1, (PART, FEAT, LIN), jnp.float32) * (2.0 / LIN) ** 0.5
    b1 = jnp.zeros((PART, 1, LIN), jnp.float32)
    # BatchNorm1d(256): gamma ~ N(1.0, 0.02), beta = 0, running stats (0, 1).
    gamma = 1.0 + 0.02 * jax.random.normal(k2, (PART, 1, LIN), jnp.float32)
    beta = jnp.zeros((PART, 1, LIN), jnp.float32)
    running_mean = jnp.zeros((PART, 1, LIN), jnp.float32)
    running_var = jnp.ones((PART, 1, LIN), jnp.float32)
    # classifier Linear(256, class_num): N(0, 0.001), bias = 0.
    w2 = 0.001 * jax.random.normal(k3, (PART, LIN, class_num), jnp.float32)
    b2 = jnp.zeros((PART, 1, class_num), jnp.float32)
    return (w1, b1, gamma, beta, running_mean, running_var, w2, b2)


def fold_params(raw_params):
    """Fold BN (eval) into Linear1, fold Linear1+Linear2 (relu=False so the
    head is affine in eval mode), fold the bias into an extra contraction row,
    pad the class dim to a lane multiple, and cast to bf16."""
    w1, b1, gamma, beta, rmean, rvar, w2, b2 = raw_params
    scale = gamma / jnp.sqrt(rvar + BN_EPS)            # (PART, 1, LIN)
    shift = beta - rmean * scale                       # (PART, 1, LIN)
    w1s = w1 * scale                                   # (PART, FEAT, LIN)
    b1s = b1 * scale + shift                           # (PART, 1, LIN)
    w_eff = jnp.einsum('pkl,pln->pkn', w1s, w2)        # (PART, FEAT, ncls)
    b_eff = jnp.einsum('pol,pln->pon', b1s, w2) + b2   # (PART, 1, ncls)
    ncls = w_eff.shape[-1]
    # Bias folded as contraction row FEAT; rows FEAT+1.. are zero alignment.
    w_aug = jnp.concatenate(
        [w_eff, b_eff,
         jnp.zeros((PART, FEAT_EXTRA - 1, ncls), jnp.float32)], axis=1)
    npad = ((ncls + LANE - 1) // LANE) * LANE
    pad_n = npad - ncls
    if pad_n:
        w_aug = jnp.pad(w_aug, ((0, 0), (0, 0), (0, pad_n)))
    return (w_aug.astype(jnp.bfloat16), ncls)


def pcb_reference(x_nchw, raw_params):
    """Pure-JAX f32 reference: unfused pool -> Linear -> BN -> Linear per part."""
    w1, b1, gamma, beta, rmean, rvar, w2, b2 = raw_params
    B, C, H, W = x_nchw.shape
    scale = gamma / jnp.sqrt(rvar + BN_EPS)
    shift = beta - rmean * scale
    outs = []
    for p in range(PART):
        h0 = (p * H) // PART
        h1 = -((-(p + 1) * H) // PART)
        xp = x_nchw[:, :, h0:h1, :].mean(axis=(2, 3))   # (B, C)
        h = xp @ w1[p] + b1[p]
        h = h * scale[p] + shift[p]
        outs.append(h @ w2[p] + b2[p])
    return outs


if __name__ == "__main__":
    key = jax.random.PRNGKey(0)
    kx, kp = jax.random.split(key)

    # Small layer4-style feature map: B=2, C=2048, H=12, W=4.
    B, H, W = 2, 12, 4
    x_feat = jax.random.normal(kx, (B, FEAT, H, W), jnp.float32)
    raw_params = init_raw_params(kp)
    folded = fold_params(raw_params)

    y_local = pcb_forward(x_feat, folded)
    y_local = jax.block_until_ready(y_local)

    assert len(y_local) == PART
    assert all(y.shape == (B, NUM_CLASSES) for y in y_local)
    assert all(bool(jnp.all(jnp.isfinite(y))) for y in y_local)

    # Numerical check against the unfused f32 reference (bf16-tolerant).
    y_ref = pcb_reference(x_feat, raw_params)
    for yk, yr in zip(y_local, y_ref):
        assert bool(jnp.allclose(yk, yr, rtol=5e-2, atol=2e-3)), (
            float(jnp.max(jnp.abs(yk - yr))))

    print("KERNEL_OK")
</pallas_src>

<mosaic_0001>
module attributes {stable_mosaic.version = 11 : i64} {
  func.func @pcb_head_kernel(%arg0: i32, %arg1: i32, %arg2: memref<1x16x2056xbf16, #tpu.memory_space<vmem>>, %arg3: memref<1x2056x128xbf16, #tpu.memory_space<vmem>>, %arg4: memref<1x16x128xf32, #tpu.memory_space<vmem>>) attributes {dimension_semantics = [#tpu.dimension_semantics<parallel>, #tpu.dimension_semantics<arbitrary>], iteration_bounds = array<i64: 6, 1>, scalar_prefetch = 0 : i64, scratch_operands = 0 : i64, tpu.core_type = #tpu.core_type<tc>, window_params = [{transform_indices = @transform_0, window_bounds = array<i64: 1, 16, 2056>}, {transform_indices = @transform_1, window_bounds = array<i64: 1, 2056, 128>}, {transform_indices = @transform_2, window_bounds = array<i64: 1, 16, 128>}]} {
    %c0 = arith.constant 0 : index
    %c0_0 = arith.constant 0 : index
    %c0_1 = arith.constant 0 : index
    %0 = vector.load %arg2[%c0, %c0_0, %c0_1] : memref<1x16x2056xbf16, #tpu.memory_space<vmem>>, vector<1x16x2056xbf16>
    %1 = vector.shape_cast %0 : vector<1x16x2056xbf16> to vector<16x2056xbf16>
    %c0_2 = arith.constant 0 : index
    %c0_3 = arith.constant 0 : index
    %c0_4 = arith.constant 0 : index
    %2 = vector.load %arg3[%c0_2, %c0_3, %c0_4] : memref<1x2056x128xbf16, #tpu.memory_space<vmem>>, vector<1x2056x128xbf16>
    %3 = vector.shape_cast %2 : vector<1x2056x128xbf16> to vector<2056x128xbf16>
    %cst = arith.constant dense<0.000000e+00> : vector<16x128xf32>
    %4 = tpu.matmul %1, %3, %cst {dimension_numbers = #tpu.dot_dimension_numbers<[1], [0], [0], [1], [0, 0, 1, 1], [], []>} : vector<16x2056xbf16>, vector<2056x128xbf16>, vector<16x128xf32> -> vector<16x128xf32>
    %c0_5 = arith.constant 0 : index
    %c0_6 = arith.constant 0 : index
    %c0_7 = arith.constant 0 : index
    %5 = vector.load %arg4[%c0_5, %c0_6, %c0_7] : memref<1x16x128xf32, #tpu.memory_space<vmem>>, vector<1x16x128xf32>
    %6 = vector.shape_cast %5 : vector<1x16x128xf32> to vector<16x128xf32>
    %7 = vector.shape_cast %4 : vector<16x128xf32> to vector<1x16x128xf32>
    tpu.vector_store %arg4[%c0_5, %c0_6, %c0_7], %7 {strides = array<i32>} : memref<1x16x128xf32, #tpu.memory_space<vmem>>, vector<1x16x128xf32>,
    return
  }
  func.func @transform_0(%arg0: i32, %arg1: i32) -> (i32, i32, i32) {
    %c0_i32 = arith.constant 0 : i32
    %c0_i32_0 = arith.constant 0 : i32
    %c0_i32_1 = arith.constant 0 : i32
    return %arg0, %c0_i32, %c0_i32_0 : i32, i32, i32
  }
  func.func @transform_1(%arg0: i32, %arg1: i32) -> (i32, i32, i32) {
    %c0_i32 = arith.constant 0 : i32
    %c0_i32_0 = arith.constant 0 : i32
    return %arg0, %c0_i32, %arg1 : i32, i32, i32
  }
  func.func @transform_2(%arg0: i32, %arg1: i32) -> (i32, i32, i32) {
    %c0_i32 = arith.constant 0 : i32
    %c0_i32_0 = arith.constant 0 : i32
    return %arg0, %c0_i32, %arg1 : i32, i32, i32
  }
}

</mosaic_0001>

<bundles_post_ra>
// kernel: tpu_custom_call.1
= control target key start
LH: loop header
LB: loop body
LE: loop exit
PB: predicated region body
PF: predicated region fallthrough
CT: control target
= control target key end

     0   :  { %7 = vsyncpa [#allocation3], 0  ;;  %s2981_s0 = inlined_call_operand.hbm [shape: bf16[6,16,2056], index: 0, kind: input, shape index: {}]   ;;  %s2982_s1 = inlined_call_operand.hbm [shape: bf16[6,2056,128], index: 1, kind: input, shape index: {}]   ;;  %s2983_s2 = inlined_call_operand.hbm [shape: f32[6,16,128], index: 2, kind: output, shape index: {}]  }
   0x1   :  { %9 = vsyncpa [#allocation3 + $0x1], 0 }
   0x2   :  { %10 = vsyncpa [#allocation6], 0 }
   0x3   :  { %12 = vsyncpa [#allocation6 + $0x1], 0 }
   0x4   :  { %13 = vsyncpa [#allocation4], 0 }
   0x5   :  { %15 = vsyncpa [#allocation4 + $0x1], 0  ;;  %s2607_s9 = smov 0   ;;  %s2609_s10 = smov 0  }
   0x6   :  { %s2611_s11 = smov 0   ;;  %s2613_s12 = smov 0  }
   0x7   :  { %s2615_s13 = smov 0   ;;  %s2617_s14 = smov 0  }
   0x8 LB: > { %s1853_s15 = sadd.s32 4294967295, %s2579_s14   ;;  %s1854_s16 = sadd.s32 4294967294, %s2579_s14   ;;  %s2579_s14 = sphi %s2617_s14, %s21_s14   ;;  %s2575_s13 = sphi %s2615_s13, %s3000_s13   ;;  %s2571_s12 = sphi %s2613_s12, %s2999_s12   ;;  %s2567_s11 = sphi %s2611_s11, %s2998_s11   ;;  %s2563_s10 = sphi %s2609_s10, %s2997_s10   ;;  %s2559_s9 = sphi %s2607_s9, %s2996_s9  }
   0x9   : > { %s33_s17 = sadd.s32 1, %s2575_s13  ;;  %s40_s18 = sadd.s32 1, %s2567_s11 }
   0xa   : > { %p35_p0 = scmp.ge.s32.totalorder %s33_s17, 6  ;;  %p47_p1 = scmp.ne.s32.totalorder %s2567_s11, %s2563_s10 }
   0xb   : > { %p48_p2 = scmp.eq.s32.totalorder %s2579_s14, 0  ;;  %p53_p3 = scmp.ne.s32.totalorder %s2563_s10, %s2559_s9 }
   0xc   : > { %s3002_s17 = smov (%p35_p0, %s33_s17), 0  ;;  %p54_p5 = scmp.eq.s32.totalorder %s1853_s15, 0 }
   0xd   : > { %p2648_p4 = por %p48_p2, %p47_p1  ;;  %s37_s20 = ssub.s32 %s2575_s13, %s3002_s17 }
   0xe   : > { %p107_p6 = scmp.eq.s32.totalorder %s1853_s15, 5  ;;  %p38_p7 = scmp.eq.s32.totalorder %s37_s20, 0 }
   0xf   : > { %p2654_p8 = por %p54_p5, %p53_p3  ;;  %p113_p10 = scmp.eq.s32.totalorder %s1854_s16, 5 }
  0x10   : > { %p2658_p9 = por %p107_p6, %p47_p1  ;;  %p2221_p12 = scmp.lt.s32.totalorder %s2579_s14, 6 }
  0x11   : > { %s2987_s21 = scalar_select %p2654_p8, 1, 0 }
  0x12   : > { %s2988_s22 = scalar_select %p2658_p9, 1, 0 }
  0x13   : > { %s2663_s23 = scalar_select %p38_p7, %s2567_s11, %s40_s18  }
  0x14   : > { %p2665_p11 = por %p113_p10, %p53_p3  ;;  %s2671_s25 = sand.u32 1, %s2567_s11  }
  0x15   : > { %s2198_s26 = smul.u32 136, %s2671_s25  ;;  %p2677_p13 = pnand %p2221_p12, %p2648_p4 }
  0x16   : > { %s2989_s24 = scalar_select %p2665_p11, 1, 0 }
  0x17   : > { %s2199_s27 = smul.u32 2176, %s2575_s13  ;;  %s137_s4 = scalar_lea.vmem [#allocation2], %s2198_s26 }
  0x18   : > { %s144_s5 = sshll.u32 %s137_s4, 4  ;;  %s134_s6 = scalar_lea.sflag [#allocation3], %s2671_s25  ;;  %s2686_s5 = int_to_ptr.vmem [resolvable:$true] %s144_s5 }
  0x19   : > { %s2684_s3 = scalar_lea.hbm %s2981_s0, %s2199_s27  ;;  %p2435_p2 = pneg %p2677_p13 }
  0x1a   : > { %s2433_s7 = scalar_lea.hbm %s2684_s3, 2176  ;;  %s2438_s16 = scalar_lea.hbm %s2981_s0, 13056 }
  0x1b   : > { %p2434_p1 = scmp.ne.s32.totalorder %s2684_s3, %s2433_s7  ;;  %p2439_p5 = scmp.lt.u32.totalorder %s2684_s3, %s2981_s0 }
  0x1c   : > { %p2440_p6 = scmp.lt.u32.totalorder %s2438_s16, %s2433_s7  ;;  %p2442_p10 = scmp.lt.u32.totalorder %s2433_s7, %s2684_s3 }
  0x1d   : > { %p2436_p3 = pnand %p2435_p2, %p2434_p1 }
  0x1e   : > { %p2441_p7 = por %p2440_p6, %p2439_p5 }
  0x1f   : > { %p2437_p4 = pneg %p2436_p3 }
  0x20   : > { %p2443_p12 = por %p2442_p10, %p2441_p7 }
  0x22   : > { %p2444_p0 = pnand %p2443_p12, %p2437_p4 }
  0x24   : > { %2447 = shalt.err (!%p2444_p0)
}
  0x25   : > { %s2448_s20 = scalar_lea.vmem %s2686_s5, 2176  ;;  %s2581_s26 = smov [#allocation2]  }
  0x26   : > { %p2449_p1 = scmp.ne.s32.totalorder %s2686_s5, %s2448_s20  ;;  %s2453_s27 = sshll.u32 %s2581_s26, 4  ;;  %s2454_s27 = int_to_ptr.vmem [resolvable:$false] %s2453_s27 }
  0x27   : > { %s2455_s29 = scalar_lea.vmem %s2454_s27, 4352  ;;  %p2456_p9 = scmp.lt.s32.totalorder %s2686_s5, %s2454_s27 }
  0x28   : > { %p2451_p3 = pnand %p2449_p1, %p2435_p2  ;;  %p2457_p5 = scmp.lt.s32.totalorder %s2455_s29, %s2448_s20 }
  0x2a   : > { %p2452_p11 = pneg %p2451_p3  ;;  %p2458_p6 = por %p2457_p5, %p2456_p9 }
  0x2c   : > { %p2459_p7 = pnand %p2458_p6, %p2452_p11 }
  0x2e   : > { %2462 = shalt.err (!%p2459_p7)
}
  0x2f   : > { %s2582_s30 = smov 1088   ;;  %s2583_s4 = smov 68  }
  0x30   : > { %2213 = dma.hbm_to_vmem [thread:$0]  (!%p2677_p13), %s2684_s3, 2176, %s2686_s5, %s134_s6, %s2582_s30, %s2582_s30, %s2583_s4  }
  0x31   : > { %p174_p0 = scmp.lt.s32.totalorder %s2579_s14, 7  ;;  %s2200_s7 = smul.u32 1028, %s2671_s25 }
  0x32   : > { %p2991_p9 = scmp.ge.s32.totalorder %s2579_s14, 1  ;;  %s2201_s15 = smul.u32 16448, %s2575_s13 }
  0x33   : > { %s158_s20 = scalar_lea.vmem [#allocation5], %s2200_s7  ;;  %s155_s3 = scalar_lea.sflag [#allocation6], %s2671_s25 }
  0x34   : > { %p2721_p11 = pnand %p2991_p9, %p174_p0  ;;  %s2729_s19 = scalar_lea.hbm %s2982_s1, %s2201_s15 }
  0x35   : > { %s166_s26 = sshll.u32 %s158_s20, 4  ;;  %s2463_s5 = scalar_lea.hbm %s2729_s19, 16448  ;;  %s2731_s26 = int_to_ptr.vmem [resolvable:$true] %s166_s26 }
  0x36   : > { %p2464_p4 = scmp.ne.s32.totalorder %s2729_s19, %s2463_s5  ;;  %s2468_s29 = scalar_lea.hbm %s2982_s1, 98688 }
  0x37   : > { %p2469_p1 = scmp.lt.u32.totalorder %s2729_s19, %s2982_s1  ;;  %p2470_p3 = scmp.lt.u32.totalorder %s2468_s29, %s2463_s5 }
  0x38   : > { %p2466_p10 = pnand %p2464_p4, %p2435_p2  ;;  %p2472_p6 = scmp.lt.u32.totalorder %s2463_s5, %s2729_s19 }
  0x39   : > { %p2471_p5 = por %p2470_p3, %p2469_p1 }
  0x3a   : > { %p2467_p12 = pneg %p2466_p10 }
  0x3b   : > { %p2473_p7 = por %p2472_p6, %p2471_p5 }
  0x3d   : > { %p2474_p0 = pnand %p2473_p7, %p2467_p12 }
  0x3f   : > { %2477 = shalt.err (!%p2474_p0)
}
  0x40   : > { %s2478_s7 = scalar_lea.vmem %s2731_s26, 16448  ;;  %s2584_s15 = smov [#allocation5]  }
  0x41   : > { %p2479_p9 = scmp.ne.s32.totalorder %s2731_s26, %s2478_s7  ;;  %s2483_s16 = sshll.u32 %s2584_s15, 4  ;;  %s2484_s16 = int_to_ptr.vmem [resolvable:$false] %s2483_s16 }
  0x42   : > { %s2485_s18 = scalar_lea.vmem %s2484_s16, 32896  ;;  %p2486_p8 = scmp.lt.s32.totalorder %s2731_s26, %s2484_s16 }
  0x43   : > { %p2481_p4 = pnand %p2479_p9, %p2435_p2  ;;  %p2487_p1 = scmp.lt.s32.totalorder %s2485_s18, %s2478_s7 }
  0x45   : > { %p2482_p10 = pneg %p2481_p4  ;;  %p2488_p3 = por %p2487_p1, %p2486_p8 }
  0x47   : > { %p2489_p5 = pnand %p2488_p3, %p2482_p10 }
  0x49   : > { %2492 = shalt.err (!%p2489_p5)
}
  0x4a   : > { %s2585_s20 = smov 64   ;;  %s2586_s5 = smov 4  }
  0x4b   : > { %2216 = dma.hbm_to_vmem [thread:$0]  (!%p2677_p13), %s2729_s19, 16448, %s2731_s26, %s155_s3, %s2585_s20, %s2585_s20, %s2586_s5  }
  0x4c   : > { %178 = sbr.rel (%p2721_p11) target bundleno = 457 (0x1c9), region = 28  ;;  %s2762_s6 = sand.u32 (!%p2721_p11), 1, %s2563_s10  }
  0x4d   : > { %s2202_s27 = smul.u32 (!%p2721_p11), 136, %s2762_s6  ;;  %s181_s29 = scalar_lea.sflag (!%p2721_p11), [#allocation3], %s2762_s6 }
  0x4e   : > { %p2993_p8 = scmp.ne.s32.totalorder (!%p2721_p11), %s2987_s21, 0 }
  0x4f   : > { %s2766_s30 = scalar_lea.vmem (!%p2721_p11), [#allocation2], %s2202_s27 }
  0x53   : > { %2546 = dma.done.wait (%p2993_p8), %s181_s29, 2176  }
  0x54   : > { %2548 = vsyncadd (%p2993_p8), %s181_s29, 4294965120  ;;  %s2203_s25 = smul.u32 1028, %s2762_s6  ;;  %s190_s28 = scalar_lea.sflag [#allocation6], %s2762_s6 }
  0x56   : > { %s2774_s8 = scalar_lea.vmem [#allocation5], %s2203_s25 }
  0x57   : > { %2550 = dma.done.wait (%p2993_p8), %s190_s28, 16448  }
  0x58   : > { %2552 = vsyncadd (%p2993_p8), %s190_s28, 4294950848  ;;  %v2279_v0 = vld [vmem:[%s2774_s8 + $0x40] sm:$0xff]   ;;  %v2283_v4 = vld [vmem:[%s2774_s8 + $0x48] sm:$0xff]   ;;  %vm1355_vm0 = vcmask 1043456   ;;  %vm2588_vm1 = vmmov 0   ;;  %vm1351_vm2 = vcmask 64512  }
  0x59   : > { %v2280_v1 = vld [vmem:[%s2774_s8 + $0xc0] sm:$0xff]   ;;  %2014 = vmatprep.subr.bf16.mxu0 %v2279_v0  ;;  %v2284_v5 = vld [vmem:[%s2774_s8 + $0xc8] sm:$0xff]   ;;  %v2287_v8 = vld [vmem:[%s2774_s8 + $0x50] sm:$0xff]   ;;  %s1860_s21 = sshll.u32 %s2762_s6, 4  ;;  %s2013_s3 = sshll.u32 %s2571_s12, 8 }
  0x5a   : > { %v2281_v2 = vld [vmem:[%s2774_s8] sm:$0xff]   ;;  %2036 = vmatprep.subr.bf16.mxu1 %v2280_v1  ;;  %v2285_v6 = vld [vmem:[%s2774_s8 + $0x8] sm:$0xff]   ;;  %v2288_v9 = vld [vmem:[%s2774_s8 + $0xd0] sm:$0xff]   ;;  %s218_s19 = scalar_lea.vmem [#allocation7], %s1860_s21  ;;  %s2933_s15 = scalar_lea.hbm %s2983_s2, %s2013_s3 }
  0x5b   : > { %v2282_v3 = vld [vmem:[%s2774_s8 + $0x80] sm:$0xff]   ;;  %2015 = vmatpush3.bf16.msra.mxu0 %v2281_v2  ;;  %v2286_v7 = vld [vmem:[%s2774_s8 + $0x88] sm:$0xff]   ;;  %v2289_v10 = vld [vmem:[%s2774_s8 + $0x10] sm:$0xff]   ;;  %s1745_s26 = sshll.u32 %s218_s19, 4  ;;  %s1731_s12 = scalar_lea.sflag [#allocation4], %s2762_s6  ;;  %s2928_s26 = int_to_ptr.vmem [resolvable:$true] %s1745_s26 }
  0x5c   : > { %2037 = vmatpush3.bf16.msra.mxu1 %v2282_v3  ;;  %2016 = vmatprep.subr.bf16.mxu0 %v2283_v4  ;;  %v2290_v11 = vld [vmem:[%s2774_s8 + $0x90] sm:$0xff]   ;;  %v2291_v12 = vld [vmem:[%s2774_s8 + $0x58] sm:$0xff]   ;;  %v2295_v16 = vld [vmem:[%s2774_s8 + $0x60] sm:$0xff]   ;;  %s2493_s16 = scalar_lea.vmem %s2928_s26, 256  ;;  %p2994_p2 = scmp.ne.s32.totalorder %s2988_s22, 0 }
  0x5d   : > { %2038 = vmatprep.subr.bf16.mxu1 %v2284_v5  ;;  %v2292_v13 = vld [vmem:[%s2774_s8 + $0xd8] sm:$0xff]   ;;  %v2296_v17 = vld [vmem:[%s2774_s8 + $0xe0] sm:$0xff]   ;;  %v2299_v20 = vld [vmem:[%s2774_s8 + $0x68] sm:$0xff]   ;;  %p2494_p13 = scmp.ne.s32.totalorder %s2928_s26, %s2493_s16  ;;  %s2589_s18 = smov [#allocation7]  }
  0x5e   : > { %v2293_v14 = vld [vmem:[%s2774_s8 + $0x18] sm:$0xff]   ;;  %v2297_v18 = vld [vmem:[%s2774_s8 + $0x20] sm:$0xff]   ;;  %v2300_v21 = vld [vmem:[%s2774_s8 + $0xe8] sm:$0xff]   ;;  %s2497_s20 = sshll.u32 %s2589_s18, 4  ;;  %s2498_s20 = int_to_ptr.vmem [resolvable:$false] %s2497_s20 }
  0x5f   : > { %2017 = vmatpush3.bf16.msra.mxu0 %v2285_v6  ;;  %v2294_v15 = vld [vmem:[%s2774_s8 + $0x98] sm:$0xff]   ;;  %v2298_v19 = vld [vmem:[%s2774_s8 + $0xa0] sm:$0xff]   ;;  %v2301_v22 = vld [vmem:[%s2774_s8 + $0x28] sm:$0xff]   ;;  %p2495_p11 = pnand %p2494_p13, %p2994_p2  ;;  %s2499_s5 = scalar_lea.vmem %s2498_s20, 512 }
  0x60   : > { %2039 = vmatpush3.bf16.msra.mxu1 %v2286_v7  ;;  %2018 = vmatprep.subr.bf16.mxu0 %v2287_v8  ;;  %v2302_v23 = vld [vmem:[%s2774_s8 + $0xa8] sm:$0xff]   ;;  %v2303_v24 = vld [vmem:[%s2774_s8 + $0x70] sm:$0xff]   ;;  %v2307_v28 = vld [vmem:[%s2774_s8 + $0x78] sm:$0xff]   ;;  %p2500_p6 = scmp.lt.s32.totalorder %s2928_s26, %s2498_s20  ;;  %p2501_p7 = scmp.lt.s32.totalorder %s2499_s5, %s2493_s16 }
  0x61   : > { %2040 = vmatprep.subr.bf16.mxu1 %v2288_v9  ;;  %v2304_v25 = vld [vmem:[%s2774_s8 + $0xf0] sm:$0xff]   ;;  %v2308_v29 = vld [vmem:[%s2774_s8 + $0xf8] sm:$0xff]   ;;  %v2317_v36 = vld [vmem:[%s2774_s8 + $0x140] sm:$0xff]   ;;  %p2496_p12 = pneg %p2495_p11 }
  0x62   : > { %v2305_v26 = vld [vmem:[%s2774_s8 + $0x30] sm:$0xff]   ;;  %v2309_v30 = vld [vmem:[%s2774_s8 + $0x38] sm:$0xff]   ;;  %v2318_v37 = vld [vmem:[%s2774_s8 + $0x100] sm:$0xff]   ;;  %p2502_p0 = por %p2501_p7, %p2500_p6 }
  0x63   : > { %2019 = vmatpush3.bf16.msra.mxu0 %v2289_v10  ;;  %v2306_v27 = vld [vmem:[%s2774_s8 + $0xb0] sm:$0xff]   ;;  %v2310_v31 = vld [vmem:[%s2774_s8 + $0xb8] sm:$0xff]   ;;  %v2319_v38 = vld [vmem:[%s2774_s8 + $0x1c0] sm:$0xff]  }
  0x64   : > { %2041 = vmatpush3.bf16.msra.mxu1 %v2290_v11  ;;  %2020 = vmatprep.subr.bf16.mxu0 %v2291_v12  ;;  %v2311_v32 = vld [vmem:[%s2766_s30] ss:$68 sps:$4 sm:$0xff]   ;;  %v2314_v34 = vld [vmem:[%s2766_s30 + $0x8] ss:$68 sps:$4 sm:$0xff]   ;;  %v2321_v40 = vld [vmem:[%s2774_s8 + $0x148] sm:$0xff]   ;;  %p2503_p9 = pnand %p2502_p0, %p2496_p12 }
  0x65   : > { %2042 = vmatprep.subr.bf16.mxu1 %v2292_v13  ;;  %v2313_v33 = vld [vmem:[%s2766_s30 + $0x4] ss:$68 sps:$4 sm:$0xff]   ;;  %v2316_v35 = vld [vmem:[%s2766_s30 + $0xc] ss:$68 sps:$4 sm:$0xff]   ;;  %v2322_v41 = vld [vmem:[%s2774_s8 + $0x108] sm:$0xff]  }
  0x66   : > { %1391 = vmatprep.mubr.bf16.mxu0 %v2313_v33  ;;  %1432 = vmatprep.mubr.bf16.mxu1 %v2316_v35  ;;  %v2320_v39 = vld [vmem:[%s2774_s8 + $0x180] sm:$0xff]   ;;  %v2323_v42 = vld [vmem:[%s2774_s8 + $0x1c8] sm:$0xff]   ;;  %v2325_v44 = vld [vmem:[%s2774_s8 + $0x150] sm:$0xff]  }
  0x67   : > { %2021 = vmatpush3.bf16.msra.mxu0 %v2293_v14  ;;  %v2324_v43 = vld [vmem:[%s2774_s8 + $0x188] sm:$0xff]   ;;  %v2326_v45 = vld [vmem:[%s2774_s8 + $0x110] sm:$0xff]   ;;  %v2329_v48 = vld [vmem:[%s2774_s8 + $0x158] sm:$0xff]  }
  0x68   : > { %2043 = vmatpush3.bf16.msra.mxu1 %v2294_v15  ;;  %2022 = vmatprep.subr.bf16.mxu0 %v2295_v16  ;;  %v2327_v46 = vld [vmem:[%s2774_s8 + $0x1d0] sm:$0xff]   ;;  %v2330_v49 = vld [vmem:[%s2774_s8 + $0x118] sm:$0xff]   ;;  %v2333_v52 = vld [vmem:[%s2774_s8 + $0x160] sm:$0xff]  }
  0x69   : > { %2044 = vmatprep.subr.bf16.mxu1 %v2296_v17  ;;  %v2328_v47 = vld [vmem:[%s2774_s8 + $0x190] sm:$0xff]   ;;  %v2331_v50 = vld [vmem:[%s2774_s8 + $0x1d8] sm:$0xff]   ;;  %v2334_v53 = vld [vmem:[%s2774_s8 + $0x120] sm:$0xff]  }
  0x6a   : > { %v2332_v51 = vld [vmem:[%s2774_s8 + $0x198] sm:$0xff]   ;;  %v2335_v54 = vld [vmem:[%s2774_s8 + $0x1e0] sm:$0xff]   ;;  %v2337_v56 = vld [vmem:[%s2774_s8 + $0x168] sm:$0xff]  }
  0x6b   : > { %2023 = vmatpush3.bf16.msra.mxu0 %v2297_v18  ;;  %v2336_v55 = vld [vmem:[%s2774_s8 + $0x1a0] sm:$0xff]   ;;  %v2338_v57 = vld [vmem:[%s2774_s8 + $0x128] sm:$0xff]   ;;  %v2341_v60 = vld [vmem:[%s2774_s8 + $0x170] sm:$0xff]  }
  0x6c   : > { %2045 = vmatpush3.bf16.msra.mxu1 %v2298_v19  ;;  %2024 = vmatprep.subr.bf16.mxu0 %v2299_v20  ;;  %v2339_v58 = vld [vmem:[%s2774_s8 + $0x1e8] sm:$0xff]   ;;  %v2342_v61 = vld [vmem:[%s2774_s8 + $0x130] sm:$0xff]   ;;  %v2345_v0 = vld [vmem:[%s2774_s8 + $0x178] sm:$0xff]  }
  0x6d   : > { %2046 = vmatprep.subr.bf16.mxu1 %v2300_v21  ;;  %v2340_v59 = vld [vmem:[%s2774_s8 + $0x1a8] sm:$0xff]   ;;  %v2343_v62 = vld [vmem:[%s2774_s8 + $0x1f0] sm:$0xff]   ;;  %v2346_v1 = vld [vmem:[%s2774_s8 + $0x138] sm:$0xff]  }
  0x6e   : > { %v2344_v63 = vld [vmem:[%s2774_s8 + $0x1b0] sm:$0xff]   ;;  %v2347_v2 = vld [vmem:[%s2774_s8 + $0x1f8] sm:$0xff]   ;;  %v2349_v4 = vld [vmem:[%s2766_s30 + $0x10] ss:$68 sps:$4 sm:$0xff]  }
  0x6f   : > { %2025 = vmatpush3.bf16.msra.mxu0 %v2301_v22  ;;  %v2348_v3 = vld [vmem:[%s2774_s8 + $0x1b8] sm:$0xff]   ;;  %v2351_v5 = vld [vmem:[%s2766_s30 + $0x14] ss:$68 sps:$4 sm:$0xff]   ;;  %v2355_v8 = vld [vmem:[%s2766_s30 + $0x1c] ss:$68 sps:$4 sm:$0xff]  }
  0x70   : > { %2047 = vmatpush3.bf16.msra.mxu1 %v2302_v23  ;;  %2026 = vmatprep.subr.bf16.mxu0 %v2303_v24  ;;  %v2352_v6 = vld [vmem:[%s2774_s8 + $0x240] sm:$0xff]   ;;  %v2353_v7 = vld [vmem:[%s2766_s30 + $0x18] ss:$68 sps:$4 sm:$0xff]   ;;  %v2367_v20 = vld [vmem:[%s2774_s8 + $0x258] sm:$0xff]  }
  0x71   : > { %2048 = vmatprep.subr.bf16.mxu1 %v2304_v25  ;;  %v2356_v9 = vld [vmem:[%s2774_s8 + $0x200] sm:$0xff]   ;;  %v2359_v12 = vld [vmem:[%s2774_s8 + $0x248] sm:$0xff]   ;;  %v2363_v16 = vld [vmem:[%s2774_s8 + $0x250] sm:$0xff]  }
  0x72   : > { %v2357_v10 = vld [vmem:[%s2774_s8 + $0x2c0] sm:$0xff]   ;;  %v2360_v13 = vld [vmem:[%s2774_s8 + $0x208] sm:$0xff]   ;;  %v2364_v17 = vld [vmem:[%s2774_s8 + $0x210] sm:$0xff]  }
  0x73   : > { %2027 = vmatpush3.bf16.msra.mxu0 %v2305_v26  ;;  %v2358_v11 = vld [vmem:[%s2774_s8 + $0x280] sm:$0xff]   ;;  %v2361_v14 = vld [vmem:[%s2774_s8 + $0x2c8] sm:$0xff]   ;;  %v2365_v18 = vld [vmem:[%s2774_s8 + $0x2d0] sm:$0xff]  }
  0x74   : > { %2049 = vmatpush3.bf16.msra.mxu1 %v2306_v27  ;;  %2028 = vmatprep.subr.bf16.mxu0 %v2307_v28  ;;  %v2362_v15 = vld [vmem:[%s2774_s8 + $0x288] sm:$0xff]   ;;  %v2366_v19 = vld [vmem:[%s2774_s8 + $0x290] sm:$0xff]   ;;  %v2368_v21 = vld [vmem:[%s2774_s8 + $0x218] sm:$0xff]  }
  0x75   : > { %2050 = vmatprep.subr.bf16.mxu1 %v2308_v29  ;;  %v2369_v22 = vld [vmem:[%s2774_s8 + $0x2d8] sm:$0xff]   ;;  %v2371_v24 = vld [vmem:[%s2774_s8 + $0x260] sm:$0xff]   ;;  %v2375_v28 = vld [vmem:[%s2774_s8 + $0x268] sm:$0xff]  }
  0x76   : > { %v2370_v23 = vld [vmem:[%s2774_s8 + $0x298] sm:$0xff]   ;;  %v2372_v25 = vld [vmem:[%s2774_s8 + $0x220] sm:$0xff]   ;;  %v2376_v29 = vld [vmem:[%s2774_s8 + $0x228] sm:$0xff]  }
  0x77   : > { %2029 = vmatpush3.bf16.msra.mxu0 %v2309_v30  ;;  %v2373_v26 = vld [vmem:[%s2774_s8 + $0x2e0] sm:$0xff]   ;;  %v2377_v30 = vld [vmem:[%s2774_s8 + $0x2e8] sm:$0xff]   ;;  %v2380_v33 = vld [vmem:[%s2774_s8 + $0x230] sm:$0xff]  }
  0x78   : > { %2051 = vmatpush3.bf16.msra.mxu1 %v2310_v31  ;;  %2058 = vmatprep.subr.bf16.mxu0 %v2317_v36  ;;  %v2374_v27 = vld [vmem:[%s2774_s8 + $0x2a0] sm:$0xff]   ;;  %v2378_v31 = vld [vmem:[%s2774_s8 + $0x2a8] sm:$0xff]   ;;  %v2382_v35 = vld [vmem:[%s2774_s8 + $0x2b0] sm:$0xff]  }
  0x79   : > { %2080 = vmatprep.subr.bf16.mxu1 %v2319_v38  ;;  %v2383_v36 = vld [vmem:[%s2774_s8 + $0x278] sm:$0xff]  }
  0x7a   : > { %1392 = vmatmul.mubr.bf16.vlgmr.msra.gmra.mrb[0].mxu0 %v2311_v32  ;;  %v2379_v32 = vld [vmem:[%s2774_s8 + $0x270] sm:$0xff]   ;;  %v2385_v38 = vld [vmem:[%s2774_s8 + $0x2f8] sm:$0xff]  }
  0x7b   : > { %1433 = vmatmul.mubr.bf16.vlgmr.msra.gmra.mrb[0].mxu1 %v2314_v34  ;;  %2059 = vmatpush3.bf16.msra.mxu0 %v2318_v37  ;;  %v2381_v34 = vld [vmem:[%s2774_s8 + $0x2f0] sm:$0xff]   ;;  %v2384_v37 = vld [vmem:[%s2774_s8 + $0x238] sm:$0xff]  }
  0x7c   : > { %2081 = vmatpush3.bf16.msra.mxu1 %v2320_v39  ;;  %2060 = vmatprep.subr.bf16.mxu0 %v2321_v40  ;;  %v2386_v39 = vld [vmem:[%s2774_s8 + $0x2b8] sm:$0xff]  }
  0x7d   : > { %2082 = vmatprep.subr.bf16.mxu1 %v2323_v42  ;;  %1473 = vmatprep.mubr.bf16.mxu0 %v2351_v5  ;;  %v2387_v40 = vld [vmem:[%s2766_s30 + $0x20] ss:$68 sps:$4 sm:$0xff]   ;;  %v2390_v42 = vld [vmem:[%s2774_s8 + $0x340] sm:$0xff]  }
  0x7e   : > { %1514 = vmatprep.mubr.bf16.mxu1 %v2355_v8  ;;  %v2418_v5 = vld [vmem:[%s2774_s8 + $0x330] sm:$0xff]   ;;  %v2421_v8 = vld [vmem:[%s2774_s8 + $0x378] sm:$0xff]  }
  0x7f   : > { %2061 = vmatpush3.bf16.msra.mxu0 %v2322_v41  ;;  %v2389_v41 = vld [vmem:[%s2766_s30 + $0x24] ss:$68 sps:$4 sm:$0xff]  }
  0x80   : > { %2083 = vmatpush3.bf16.msra.mxu1 %v2324_v43  ;;  %2062 = vmatprep.subr.bf16.mxu0 %v2325_v44  ;;  %v2391_v43 = vld [vmem:[%s2766_s30 + $0x28] ss:$68 sps:$4 sm:$0xff]  }
  0x81   : > { %2084 = vmatprep.subr.bf16.mxu1 %v2327_v46  ;;  %v2393_v44 = vld [vmem:[%s2766_s30 + $0x2c] ss:$68 sps:$4 sm:$0xff]  }
  0x82   : > { %v2395_v46 = vld [vmem:[%s2774_s8 + $0x3c0] sm:$0xff]  }
  0x83   : > { %2063 = vmatpush3.bf16.msra.mxu0 %v2326_v45  ;;  %v2394_v45 = vld [vmem:[%s2774_s8 + $0x300] sm:$0xff]  }
  0x84   : > { %2085 = vmatpush3.bf16.msra.mxu1 %v2328_v47  ;;  %2064 = vmatprep.subr.bf16.mxu0 %v2329_v48  ;;  %v2396_v47 = vld [vmem:[%s2774_s8 + $0x380] sm:$0xff]   ;;  %v2397_v48 = vld [vmem:[%s2774_s8 + $0x348] sm:$0xff]  }
  0x85   : > { %2086 = vmatprep.subr.bf16.mxu1 %v2331_v50  ;;  %v2399_v50 = vld [vmem:[%s2774_s8 + $0x3c8] sm:$0xff]  }
  0x87   : > { %2065 = vmatpush3.bf16.msra.mxu0 %v2330_v49  ;;  %v2398_v49 = vld [vmem:[%s2774_s8 + $0x308] sm:$0xff]  }
  0x88   : > { %2087 = vmatpush3.bf16.msra.mxu1 %v2332_v51  ;;  %2066 = vmatprep.subr.bf16.mxu0 %v2333_v52  ;;  %v2400_v51 = vld [vmem:[%s2774_s8 + $0x388] sm:$0xff]   ;;  %v2401_v52 = vld [vmem:[%s2774_s8 + $0x350] sm:$0xff]  }
  0x89   : > { %2088 = vmatprep.subr.bf16.mxu1 %v2335_v54  ;;  %v2403_v54 = vld [vmem:[%s2774_s8 + $0x3d0] sm:$0xff]  }
  0x8b   : > { %2067 = vmatpush3.bf16.msra.mxu0 %v2334_v53  ;;  %v2402_v53 = vld [vmem:[%s2774_s8 + $0x310] sm:$0xff]  }
  0x8c   : > { %2089 = vmatpush3.bf16.msra.mxu1 %v2336_v55  ;;  %2068 = vmatprep.subr.bf16.mxu0 %v2337_v56  ;;  %v2404_v55 = vld [vmem:[%s2774_s8 + $0x390] sm:$0xff]   ;;  %v2405_v56 = vld [vmem:[%s2774_s8 + $0x358] sm:$0xff]  }
  0x8d   : > { %2090 = vmatprep.subr.bf16.mxu1 %v2339_v58  ;;  %v2407_v58 = vld [vmem:[%s2774_s8 + $0x3d8] sm:$0xff]  }
  0x8f   : > { %2069 = vmatpush3.bf16.msra.mxu0 %v2338_v57  ;;  %v2406_v57 = vld [vmem:[%s2774_s8 + $0x318] sm:$0xff]  }
  0x90   : > { %2091 = vmatpush3.bf16.msra.mxu1 %v2340_v59  ;;  %2070 = vmatprep.subr.bf16.mxu0 %v2341_v60  ;;  %v2408_v59 = vld [vmem:[%s2774_s8 + $0x398] sm:$0xff]   ;;  %v2409_v60 = vld [vmem:[%s2774_s8 + $0x360] sm:$0xff]  }
  0x91   : > { %2092 = vmatprep.subr.bf16.mxu1 %v2343_v62  ;;  %v2411_v62 = vld [vmem:[%s2774_s8 + $0x3e0] sm:$0xff]  }
  0x93   : > { %2071 = vmatpush3.bf16.msra.mxu0 %v2342_v61  ;;  %v2410_v61 = vld [vmem:[%s2774_s8 + $0x320] sm:$0xff]  }
  0x94   : > { %2093 = vmatpush3.bf16.msra.mxu1 %v2344_v63  ;;  %2072 = vmatprep.subr.bf16.mxu0 %v2345_v0  ;;  %v2412_v63 = vld [vmem:[%s2774_s8 + $0x3a0] sm:$0xff]   ;;  %v2413_v0 = vld [vmem:[%s2774_s8 + $0x368] sm:$0xff]  }
  0x95   : > { %2094 = vmatprep.subr.bf16.mxu1 %v2347_v2  ;;  %v2415_v2 = vld [vmem:[%s2774_s8 + $0x3e8] sm:$0xff]  }
  0x97   : > { %2073 = vmatpush3.bf16.msra.mxu0 %v2346_v1  ;;  %v2414_v1 = vld [vmem:[%s2774_s8 + $0x328] sm:$0xff]  }
  0x98   : > { %2095 = vmatpush3.bf16.msra.mxu1 %v2348_v3  ;;  %2102 = vmatprep.subr.bf16.mxu0 %v2352_v6  ;;  %v2416_v3 = vld [vmem:[%s2774_s8 + $0x3a8] sm:$0xff]   ;;  %v2419_v6 = vld [vmem:[%s2774_s8 + $0x3f0] sm:$0xff]  }
  0x99   : > { %2124 = vmatprep.subr.bf16.mxu1 %v2357_v10  ;;  %v2423_v10 = vld [vmem:[%s2774_s8 + $0x3f8] sm:$0xff]  }
  0x9a   : > { %1474 = vmatmul.mubr.bf16.vlgmr.msra.gmra.mrb[4].mxu0 %v2349_v4  ;;  %v2417_v4 = vld [vmem:[%s2774_s8 + $0x370] sm:$0xff]  }
  0x9b   : > { %2103 = vmatpush3.bf16.msra.mxu0 %v2356_v9  ;;  %1515 = vmatmul.mubr.bf16.vlgmr.msra.gmra.mrb[4].mxu1 %v2353_v7  ;;  %v2420_v7 = vld [vmem:[%s2774_s8 + $0x3b0] sm:$0xff]   ;;  %v2422_v9 = vld [vmem:[%s2774_s8 + $0x338] sm:$0xff]  }
  0x9c   : > { %2125 = vmatpush3.bf16.msra.mxu1 %v2358_v11  ;;  %2104 = vmatprep.subr.bf16.mxu0 %v2359_v12  ;;  %v2424_v11 = vld [vmem:[%s2774_s8 + $0x3b8] sm:$0xff]   ;;  %v2425_v12 = vld [vmem:[%s2766_s30 + $0x30] ss:$68 sps:$4 sm:$0xff]  }
  0x9d   : > { %2126 = vmatprep.subr.bf16.mxu1 %v2361_v14  ;;  %1555 = vmatprep.mubr.bf16.mxu0 %v2389_v41  ;;  %v2427_v14 = vld [vmem:[%s2766_s30 + $0x34] ss:$68 sps:$4 sm:$0xff]  }
  0x9e   : > { %1596 = vmatprep.mubr.bf16.mxu1 %v2393_v44 }
  0x9f   : > { %2105 = vmatpush3.bf16.msra.mxu0 %v2360_v13  ;;  %v2587_v13 = vmov 0.0  }
  0xa0   : > { %2127 = vmatpush3.bf16.msra.mxu1 %v2362_v15  ;;  %2106 = vmatprep.subr.bf16.mxu0 %v2363_v16  ;;  %v2428_v15 = vld [vmem:[%s2766_s30 + $0x38] ss:$68 sps:$4 sm:$0xff]  }
  0xa1   : > { %2128 = vmatprep.subr.bf16.mxu1 %v2365_v18  ;;  %v2430_v16 = vld [vmem:[%s2766_s30 + $0x3c] ss:$68 sps:$4 sm:$0xff]  }
  0xa3   : > { %2107 = vmatpush3.bf16.msra.mxu0 %v2364_v17  ;;  %v2431_v17 = vld [vmem:[%s2774_s8 + $0x400] ss:$0 sps:$4 sm:$0xff]  }
  0xa4   : > { %2129 = vmatpush3.bf16.msra.mxu1 %v2366_v19  ;;  %2108 = vmatprep.subr.bf16.mxu0 %v2367_v20  ;;  %v1357_v18 = vsel %vm1355_vm0, %v2431_v17, 0  ;;  %v2432_v19 = vld [vmem:[%s2766_s30 + $0x40] ss:$68 sps:$4 sm:$0xff]  }
  0xa5   : > { %2130 = vmatprep.subr.bf16.mxu1 %v2369_v22 }
  0xa7   : > { %2109 = vmatpush3.bf16.msra.mxu0 %v2368_v21 }
  0xa8   : > { %2131 = vmatpush3.bf16.msra.mxu1 %v2370_v23  ;;  %2110 = vmatprep.subr.bf16.mxu0 %v2371_v24 }
  0xa9   : > { %2132 = vmatprep.subr.bf16.mxu1 %v2373_v26 }
  0xab   : > { %2111 = vmatpush3.bf16.msra.mxu0 %v2372_v25 }
  0xac   : > { %2133 = vmatpush3.bf16.msra.mxu1 %v2374_v27  ;;  %2112 = vmatprep.subr.bf16.mxu0 %v2375_v28 }
  0xad   : > { %2134 = vmatprep.subr.bf16.mxu1 %v2377_v30 }
  0xaf   : > { %2113 = vmatpush3.bf16.msra.mxu0 %v2376_v29 }
  0xb0   : > { %2135 = vmatpush3.bf16.msra.mxu1 %v2378_v31  ;;  %2114 = vmatprep.subr.bf16.mxu0 %v2379_v32 }
  0xb1   : > { %2136 = vmatprep.subr.bf16.mxu1 %v2381_v34 }
  0xb3   : > { %2115 = vmatpush3.bf16.msra.mxu0 %v2380_v33 }
  0xb4   : > { %2137 = vmatpush3.bf16.msra.mxu1 %v2382_v35  ;;  %2116 = vmatprep.subr.bf16.mxu0 %v2383_v36 }
  0xb5   : > { %2138 = vmatprep.subr.bf16.mxu1 %v2385_v38 }
  0xb7   : > { %2117 = vmatpush3.bf16.msra.mxu0 %v2384_v37 }
  0xb8   : > { %2139 = vmatpush3.bf16.msra.mxu1 %v2386_v39  ;;  %2146 = vmatprep.subr.bf16.mxu0 %v2390_v42 }
  0xb9   : > { %2168 = vmatprep.subr.bf16.mxu1 %v2395_v46 }
  0xba   : > { %1556 = vmatmul.mubr.bf16.vlgmr.msra.gmra.mrb[8].mxu0 %v2387_v40 }
  0xbb   : > { %2147 = vmatpush3.bf16.msra.mxu0 %v2394_v45  ;;  %1597 = vmatmul.mubr.bf16.vlgmr.msra.gmra.mrb[8].mxu1 %v2391_v43 }
  0xbc   : > { %2169 = vmatpush3.bf16.msra.mxu1 %v2396_v47  ;;  %2148 = vmatprep.subr.bf16.mxu0 %v2397_v48 }
  0xbd   : > { %2170 = vmatprep.subr.bf16.mxu1 %v2399_v50  ;;  %1637 = vmatprep.mubr.bf16.mxu0 %v2427_v14 }
  0xbe   : > { %1678 = vmatprep.mubr.bf16.mxu1 %v2430_v16 }
  0xbf   : > { %2149 = vmatpush3.bf16.msra.mxu0 %v2398_v49 }
  0xc0   : > { %2171 = vmatpush3.bf16.msra.mxu1 %v2400_v51  ;;  %2150 = vmatprep.subr.bf16.mxu0 %v2401_v52 }
  0xc1   : > { %2172 = vmatprep.subr.bf16.mxu1 %v2403_v54 }
  0xc3   : > { %2151 = vmatpush3.bf16.msra.mxu0 %v2402_v53 }
  0xc4   : > { %2173 = vmatpush3.bf16.msra.mxu1 %v2404_v55  ;;  %2152 = vmatprep.subr.bf16.mxu0 %v2405_v56 }
  0xc5   : > { %2174 = vmatprep.subr.bf16.mxu1 %v2407_v58 }
  0xc7   : > { %2153 = vmatpush3.bf16.msra.mxu0 %v2406_v57 }
  0xc8   : > { %2175 = vmatpush3.bf16.msra.mxu1 %v2408_v59  ;;  %2154 = vmatprep.subr.bf16.mxu0 %v2409_v60 }
  0xc9   : > { %2176 = vmatprep.subr.bf16.mxu1 %v2411_v62 }
  0xcb   : > { %2155 = vmatpush3.bf16.msra.mxu0 %v2410_v61 }
  0xcc   : > { %2177 = vmatpush3.bf16.msra.mxu1 %v2412_v63  ;;  %2156 = vmatprep.subr.bf16.mxu0 %v2413_v0 }
  0xcd   : > { %2178 = vmatprep.subr.bf16.mxu1 %v2415_v2 }
  0xcf   : > { %2157 = vmatpush3.bf16.msra.mxu0 %v2414_v1 }
  0xd0   : > { %2179 = vmatpush3.bf16.msra.mxu1 %v2416_v3  ;;  %2158 = vmatprep.subr.bf16.mxu0 %v2417_v4 }
  0xd1   : > { %2180 = vmatprep.subr.bf16.mxu1 %v2419_v6 }
  0xd3   : > { %2159 = vmatpush3.bf16.msra.mxu0 %v2418_v5 }
  0xd4   : > { %2181 = vmatpush3.bf16.msra.mxu1 %v2420_v7  ;;  %2160 = vmatprep.subr.bf16.mxu0 %v2421_v8 }
  0xd5   : > { %2182 = vmatprep.subr.bf16.mxu1 %v2423_v10 }
  0xd7   : > { %2161 = vmatpush3.bf16.msra.mxu0 %v2422_v9 }
  0xd8   : > { %2192 = vmatprep.subr.bf16.mxu0 %v2587_v13  ;;  %2183 = vmatpush3.bf16.msra.mxu1 %v2424_v11 }
  0xda   : > { %1638 = vmatmul.mubr.bf16.vlgmr.msra.gmra.mrb[12].mxu0 %v2425_v12 }
  0xdb   : > { %1679 = vmatmul.mubr.bf16.vlgmr.msra.gmra.mrb[12].mxu1 %v2428_v15  ;;  %2194 = vmatprep.mubr.msk.bf16.mxu0 %vm2588_vm1, %v2587_v13 }
  0xdc   : > { %2193 = vmatpush3.bf16.msra.mxu0 %v1357_v18 }
  0xe2   : > { %2195 = vmatmul.mubr.msk.bf16.vlgmr.msra.gmra.mrb[16].mxu0 %vm1351_vm2, %v2432_v19 }
 0x14d   : > { %v2030_v20 = vpop.f32.mrb[0].mxu0 }
 0x14e   : > { %v2052_v21 = vpop.f32.mrb[0].mxu1  ;;  %v2031_v22 = vpop.f32.mrb[1].mxu0 }
 0x14f   : > { %v2032_v23 = vadd.f32 %v2031_v22, %v2030_v20  ;;  %v2053_v24 = vpop.f32.mrb[1].mxu1  ;;  %v2033_v25 = vpop.f32.mrb[2].mxu0 }
 0x150   : > { %v2054_v26 = vadd.f32 %v2053_v24, %v2052_v21  ;;  %v2055_v27 = vpop.f32.mrb[2].mxu1  ;;  %v2034_v28 = vpop.f32.mrb[3].mxu0 }
 0x151   : > { %v2035_v29 = vadd.f32 %v2034_v28, %v2033_v25  ;;  %v2056_v30 = vpop.f32.mrb[3].mxu1 }
 0x152   : > { %v1435_v31 = vadd.f32 %v2054_v26, %v2032_v23  ;;  %v2057_v32 = vadd.f32 %v2056_v30, %v2055_v27 }
 0x154   : > { %v1438_v33 = vadd.f32 %v2057_v32, %v2035_v29 }
 0x16d   : > { %v2074_v34 = vpop.f32.mrb[4].mxu0 }
 0x16e   : > { %v2075_v35 = vpop.f32.mrb[5].mxu0  ;;  %v2096_v38 = vpop.f32.mrb[4].mxu1 }
 0x16f   : > { %v2076_v36 = vadd.f32 %v2075_v35, %v2074_v34  ;;  %v2077_v37 = vpop.f32.mrb[6].mxu0  ;;  %v2097_v42 = vpop.f32.mrb[5].mxu1 }
 0x170   : > { %v2078_v39 = vpop.f32.mrb[7].mxu0  ;;  %v2098_v43 = vadd.f32 %v2097_v42, %v2096_v38  ;;  %v2099_v44 = vpop.f32.mrb[6].mxu1 }
 0x171   : > { %v1476_v40 = vadd.f32 %v2076_v36, %v1435_v31  ;;  %v2079_v41 = vadd.f32 %v2078_v39, %v2077_v37  ;;  %v2100_v46 = vpop.f32.mrb[7].mxu1 }
 0x172   : > { %v2101_v48 = vadd.f32 %v2100_v46, %v2099_v44 }
 0x173   : > { %v1479_v45 = vadd.f32 %v2079_v41, %v1438_v33  ;;  %v1517_v47 = vadd.f32 %v2098_v43, %v1476_v40 }
 0x175   : > { %v1520_v49 = vadd.f32 %v2101_v48, %v1479_v45 }
 0x18d   : > { %v2118_v50 = vpop.f32.mrb[8].mxu0 }
 0x18e   : > { %v2119_v51 = vpop.f32.mrb[9].mxu0  ;;  %v2140_v54 = vpop.f32.mrb[8].mxu1 }
 0x18f   : > { %v2120_v52 = vadd.f32 %v2119_v51, %v2118_v50  ;;  %v2121_v53 = vpop.f32.mrb[10].mxu0  ;;  %v2141_v56 = vpop.f32.mrb[9].mxu1 }
 0x190   : > { %v2122_v55 = vpop.f32.mrb[11].mxu0  ;;  %v2142_v59 = vadd.f32 %v2141_v56, %v2140_v54  ;;  %v2143_v60 = vpop.f32.mrb[10].mxu1 }
 0x191   : > { %v1558_v57 = vadd.f32 %v2120_v52, %v1517_v47  ;;  %v2123_v58 = vadd.f32 %v2122_v55, %v2121_v53  ;;  %v2144_v61 = vpop.f32.mrb[11].mxu1 }
 0x192   : > { %v2145_v0 = vadd.f32 %v2144_v61, %v2143_v60 }
 0x193   : > { %v1561_v62 = vadd.f32 %v2123_v58, %v1520_v49  ;;  %v1599_v63 = vadd.f32 %v2142_v59, %v1558_v57 }
 0x195   : > { %v1602_v1 = vadd.f32 %v2145_v0, %v1561_v62 }
 0x1ad   : > { %v2162_v2 = vpop.f32.mrb[12].mxu0 }
 0x1ae   : > { %v2163_v3 = vpop.f32.mrb[13].mxu0  ;;  %v2184_v4 = vpop.f32.mrb[12].mxu1 }
 0x1af   : > { %v2164_v5 = vadd.f32 %v2163_v3, %v2162_v2  ;;  %v2165_v6 = vpop.f32.mrb[14].mxu0  ;;  %v2185_v7 = vpop.f32.mrb[13].mxu1 }
 0x1b0   : > { %v2186_v8 = vadd.f32 %v2185_v7, %v2184_v4  ;;  %v2166_v9 = vpop.f32.mrb[15].mxu0  ;;  %v2187_v10 = vpop.f32.mrb[14].mxu1 }
 0x1b1   : > { %v1640_v11 = vadd.f32 %v2164_v5, %v1599_v63  ;;  %v2167_v12 = vadd.f32 %v2166_v9, %v2165_v6  ;;  %v2188_v13 = vpop.f32.mrb[15].mxu1 }
 0x1b2   : > { %v2189_v14 = vadd.f32 %v2188_v13, %v2187_v10 }
 0x1b3   : > { %v1643_v15 = vadd.f32 %v2167_v12, %v1602_v1  ;;  %v1681_v16 = vadd.f32 %v2186_v8, %v1640_v11 }
 0x1b5   : > { %v1721_v17 = vpop.f32.mrb[16].mxu0  ;;  %v1684_v18 = vadd.f32 %v2189_v14, %v1643_v15 }
 0x1b6   : > { %v1722_v19 = vadd.f32 %v1721_v17, %v1681_v16  ;;  %v2196_v20 = vpop.f32.mrb[17].mxu0 }
 0x1b7   : > { %v1724_v21 = vpop.f32.mrb[18].mxu0 }
 0x1b8   : > { %1728 = vst [vmem:[%s218_s19] sm:$0xff] %v1722_v19  ;;  %v1725_v22 = vadd.f32 %v1724_v21, %v1684_v18  ;;  %v2197_v23 = vpop.f32.mrb[19].mxu0 }
 0x1ba   : > { %1729 = vst [vmem:[%s218_s19 + $0x8] sm:$0xff] %v1725_v22 }
 0x1bb   : > { %2506 = shalt.err (!%p2503_p9)
}
 0x1bc   : > { %s2507_s27 = scalar_lea.hbm %s2933_s15, 256  ;;  %s2511_s25 = scalar_lea.hbm %s2983_s2, 1536 }
 0x1bd   : > { %p2508_p4 = scmp.ne.s32.totalorder %s2933_s15, %s2507_s27  ;;  %p2512_p3 = scmp.lt.u32.totalorder %s2933_s15, %s2983_s2 }
 0x1be   : > { %p2513_p5 = scmp.lt.u32.totalorder %s2511_s25, %s2507_s27  ;;  %p2515_p13 = scmp.lt.u32.totalorder %s2507_s27, %s2933_s15 }
 0x1bf   : > { %p2509_p10 = pnand %p2508_p4, %p2994_p2 }
 0x1c0   : > { %p2514_p8 = por %p2513_p5, %p2512_p3 }
 0x1c1   : > { %p2510_p1 = pneg %p2509_p10 }
 0x1c2   : > { %p2516_p11 = por %p2515_p13, %p2514_p8 }
 0x1c4   : > { %p2517_p12 = pnand %p2516_p11, %p2510_p1 }
 0x1c6   : > { %2520 = shalt.err (!%p2517_p12)
}
 0x1c7   : > { %s2590_s21 = smov 128   ;;  %s2591_s19 = smov 8  }
 0x1c8   : > { %2208 = dma.vmem_to_hbm [thread:$0]  (%p2994_p2), %s2928_s26, 256, %s2933_s15, %s1731_s12, %s2590_s21, %s2590_s21, %s2591_s19  }
 0x1c9 PF: > { %p2222_p6 = scmp.ge.s32.totalorder %s2579_s14, 2  ;;  %s1760_s3 = sand.u32 1, %s2559_s9  }
 0x1ca   : > { %p2995_p7 = scmp.ne.s32.totalorder %s2989_s24, 0  ;;  %s1761_s4 = scalar_lea.sflag [#allocation4], %s1760_s3 }
 0x1cc   : > { %p2218_p0 = pnand %p2222_p6, %p2995_p7 }
 0x1ce   : > { %2554 = dma.done.wait (!%p2218_p0), %s1761_s4, 256  }
 0x1cf   : > { %2556 = vsyncadd (!%p2218_p0), %s1761_s4, 4294967040  ;;  %s21_s14 = sadd.s32 1, %s2579_s14   ;;  %s2996_s9 = smov %s2563_s10 }
 0x1d0   : > { %p18_p9 = scmp.ge.s32.totalorder %s21_s14, 8   ;;  %s2997_s10 = smov %s2567_s11 }
 0x1d1   : > { %s2998_s11 = smov %s2663_s23  ;;  %s2999_s12 = smov %s2575_s13 }
 0x1d2   : > { %s3000_s13 = smov %s3002_s17  ;;  %20 = sbr.rel (!%p18_p9) target bundleno = 8 (0x8), region = 86 }
 0x1d9   :  { %1766 = vsyncpa [#allocation3], 1 }
 0x1da   :  { %1768 = vsyncpa [#allocation3 + $0x1], 1 }
 0x1db   :  { %1769 = vsyncpa [#allocation6], 1 }
 0x1dc   :  { %1771 = vsyncpa [#allocation6 + $0x1], 1 }
 0x1dd   :  { %1772 = vsyncpa [#allocation4], 1 }
 0x1de   :  { %1774 = vsyncpa [#allocation4 + $0x1], 1 }

</bundles_post_ra>
